<compile_context>
chip_gen: v7x
topology: tpu7x:2x2x1
jax: 0.10.0
libtpu: 0.0.40
codegen_flags: <defaults>
</compile_context>

<pallas_src>
import functools

import jax
import jax.numpy as jnp
from jax.experimental import pallas as pl
from jax.experimental.pallas import tpu as pltpu


def _round_up(x: int, m: int) -> int:
    return ((x + m - 1) // m) * m


# ----------------------------- Pallas kernel --------------------------------
def _head_kernel(x_ref, wc_ref, bc_ref, wr_ref, br_ref, cls_ref, reg_ref):
    """One (spatial-tile, batch) grid step of the 1x1 cls/reg heads.

    x_ref:   (C, t_hw)       f32  activations (NCHW-native; lane axis = spatial)
    wc_ref:  (O_cls, C)      bf16 conv_cls weight (grid-resident)
    bc_ref:  (O_cls, 1)      f32  conv_cls bias   (grid-resident)
    wr_ref:  (O_reg, C)      bf16 conv_reg weight (grid-resident)
    br_ref:  (O_reg, 1)      f32  conv_reg bias   (grid-resident)
    cls_ref: (O_cls, t_hw)   cls logits
    reg_ref: (O_reg, t_hw)   bbox deltas
    """
    x = x_ref[...].astype(jnp.bfloat16)                              # cast in-kernel
    cls = jnp.dot(wc_ref[...], x, preferred_element_type=jnp.float32) + bc_ref[...]
    reg = jnp.dot(wr_ref[...], x, preferred_element_type=jnp.float32) + br_ref[...]
    cls_ref[...] = cls.astype(cls_ref.dtype)
    reg_ref[...] = reg.astype(reg_ref.dtype)


def _run_heads(x, w_cls, b_cls, w_reg, b_reg, *, t_hw, out_dtype, vmem_limit_bytes=None):
    """x: (N, C, HW) f32 -> ((N, O_cls, HW), (N, O_reg, HW)) in out_dtype."""
    N, C, HW = x.shape
    o_cls = w_cls.shape[0]
    o_reg = w_reg.shape[0]
    grid = (pl.cdiv(HW, t_hw), N)   # large spatial axis first (megacore split on v7x)

    return pl.pallas_call(
        _head_kernel,
        out_shape=(
            jax.ShapeDtypeStruct((N, o_cls, HW), out_dtype),
            jax.ShapeDtypeStruct((N, o_reg, HW), out_dtype),
        ),
        grid_spec=pltpu.PrefetchScalarGridSpec(
            num_scalar_prefetch=0,
            grid=grid,
            in_specs=[
                # batch dim squeezed out of the kernel refs (None == pl.Squeezed()).
                pl.BlockSpec((None, C, t_hw), lambda j, n: (n, 0, j)),   # activations
                pl.BlockSpec((o_cls, C), lambda j, n: (0, 0)),           # cls weight (resident)
                pl.BlockSpec((o_cls, 1), lambda j, n: (0, 0)),           # cls bias   (resident)
                pl.BlockSpec((o_reg, C), lambda j, n: (0, 0)),           # reg weight (resident)
                pl.BlockSpec((o_reg, 1), lambda j, n: (0, 0)),           # reg bias   (resident)
            ],
            out_specs=[
                pl.BlockSpec((None, o_cls, t_hw), lambda j, n: (n, 0, j)),
                pl.BlockSpec((None, o_reg, t_hw), lambda j, n: (n, 0, j)),
            ],
        ),
        compiler_params=pltpu.CompilerParams(
            dimension_semantics=("parallel", "parallel"),
            vmem_limit_bytes=vmem_limit_bytes,
        ),
    )(x, w_cls, b_cls, w_reg, b_reg)


# ----------------------------- AnchorHead module ----------------------------
class AnchorHeadPallas:
    """JAX/Pallas re-implementation of AnchorHead.forward (per-level 1x1 conv heads)."""

    def __init__(
        self,
        num_classes,
        in_channels,
        feat_channels=256,
        anchor_scales=(8, 16, 32),
        anchor_ratios=(0.5, 1.0, 2.0),
        anchor_strides=(4, 8, 16, 32, 64),
        use_sigmoid_cls=True,
        hw_tile=1024,            # spatial lane tile; 2048-4096 recommended on v6e/v7x
        out_dtype=jnp.float32,   # bf16 halves output HBM traffic if downstream tolerates it
        vmem_limit_bytes=None,   # set when using large cls heads + big tiles
        seed=0,
    ):
        self.num_classes = num_classes
        self.in_channels = in_channels
        self.feat_channels = feat_channels
        self.use_sigmoid_cls = use_sigmoid_cls
        self.cls_out_channels = num_classes - 1 if use_sigmoid_cls else num_classes
        self.num_anchors = len(anchor_ratios) * len(anchor_scales)

        self.o_cls = self.num_anchors * self.cls_out_channels
        self.o_reg = self.num_anchors * 4
        self.hw_tile = _round_up(int(hw_tile), 128)
        self.out_dtype = out_dtype
        self.vmem_limit_bytes = vmem_limit_bytes

        # Deterministic init, mirroring normal_init(std=0.01), bias=0.
        key = jax.random.PRNGKey(seed)
        k_cls, k_reg = jax.random.split(key)
        # (O, C) = squeezed PyTorch Conv2d(1x1) weight (O, C, 1, 1).
        self.w_cls = 0.01 * jax.random.normal(k_cls, (self.o_cls, feat_channels), jnp.float32)
        self.w_reg = 0.01 * jax.random.normal(k_reg, (self.o_reg, feat_channels), jnp.float32)
        self.b_cls = jnp.zeros((self.o_cls,), jnp.float32)
        self.b_reg = jnp.zeros((self.o_reg,), jnp.float32)

        # Kernel-side parameters: bf16 weights for the MXU, f32 column biases.
        self.w_cls_bf16 = self.w_cls.astype(jnp.bfloat16)
        self.w_reg_bf16 = self.w_reg.astype(jnp.bfloat16)
        self.b_cls2d = self.b_cls.reshape(self.o_cls, 1)
        self.b_reg2d = self.b_reg.reshape(self.o_reg, 1)

        # TODO(synk): anchor generation, loss, get_bboxes / multiclass NMS are
        # training / post-processing outside forward() and are not Pallas kernels here.

    def forward(self, feats):
        """feats: list/tuple of NCHW feature maps (one per pyramid level).

        Returns (cls_scores, bbox_preds): two tuples, one NCHW tensor per level
        (same convention as mmdet's multi_apply).
        """
        cls_scores, bbox_preds = [], []
        for f in feats:
            N, C, H, W = f.shape
            assert C == self.feat_channels
            hw = H * W
            # Full-extent block for small levels (no masking), capped tile otherwise.
            t_hw = hw if hw <= self.hw_tile else self.hw_tile
            cls, reg = _run_heads(
                f.reshape(N, C, hw),                      # free NCHW-native view
                self.w_cls_bf16, self.b_cls2d,
                self.w_reg_bf16, self.b_reg2d,
                t_hw=t_hw, out_dtype=self.out_dtype,
                vmem_limit_bytes=self.vmem_limit_bytes,
            )
            cls_scores.append(cls.reshape(N, self.o_cls, H, W))   # free reshape
            bbox_preds.append(reg.reshape(N, self.o_reg, H, W))
        return tuple(cls_scores), tuple(bbox_preds)

    def forward_single(self, x):
        cls_scores, bbox_preds = self.forward([x])
        return cls_scores[0], bbox_preds[0]


# ----------------------------- reference check ------------------------------
def _reference_forward(head, feats):
    """Pure-JAX reference using the same bf16-rounded weights/activations."""
    w_cls = head.w_cls_bf16.astype(jnp.float32)
    w_reg = head.w_reg_bf16.astype(jnp.float32)
    cls_list, reg_list = [], []
    for x in feats:
        N, C, H, W = x.shape
        xb = x.astype(jnp.bfloat16).astype(jnp.float32).reshape(N, C, H * W)
        cls = jnp.einsum("oc,nch->noh", w_cls, xb, precision=jax.lax.Precision.HIGHEST)
        reg = jnp.einsum("oc,nch->noh", w_reg, xb, precision=jax.lax.Precision.HIGHEST)
        cls = cls + head.b_cls[None, :, None]
        reg = reg + head.b_reg[None, :, None]
        cls_list.append(cls.reshape(N, head.o_cls, H, W))
        reg_list.append(reg.reshape(N, head.o_reg, H, W))
    return cls_list, reg_list


if __name__ == "__main__":
    # Small RPN-like config: num_classes=2 (sigmoid) -> cls_out_channels=1,
    # 3 scales x 3 ratios -> 9 anchors; feat_channels=32; two feature levels.
    head = AnchorHeadPallas(
        num_classes=2,
        in_channels=32,
        feat_channels=32,
        anchor_strides=(4, 8),
        seed=0,
    )

    key = jax.random.PRNGKey(0)
    k0, k1 = jax.random.split(key)
    feats = [
        jax.random.normal(k0, (2, 32, 16, 16), dtype=jnp.float32),  # level 0
        jax.random.normal(k1, (2, 32, 8, 8), dtype=jnp.float32),    # level 1
    ]

    cls_scores, bbox_preds = head.forward(feats)
    jax.block_until_ready((cls_scores, bbox_preds))

    ref_cls, ref_reg = _reference_forward(head, feats)
    for lvl, x in enumerate(feats):
        assert cls_scores[lvl].shape == (2, 9 * 1, x.shape[2], x.shape[3])
        assert bbox_preds[lvl].shape == (2, 9 * 4, x.shape[2], x.shape[3])
        assert jnp.allclose(cls_scores[lvl], ref_cls[lvl], atol=1e-4, rtol=1e-4)
        assert jnp.allclose(bbox_preds[lvl], ref_reg[lvl], atol=1e-4, rtol=1e-4)

    print("KERNEL_OK")
</pallas_src>

<mosaic_0001>
module attributes {stable_mosaic.version = 11 : i64} {
  func.func @_head_kernel(%arg0: i32, %arg1: i32, %arg2: memref<1x32x256xf32, #tpu.memory_space<vmem>>, %arg3: memref<9x32xbf16, #tpu.memory_space<vmem>>, %arg4: memref<9x1xf32, #tpu.memory_space<vmem>>, %arg5: memref<36x32xbf16, #tpu.memory_space<vmem>>, %arg6: memref<36x1xf32, #tpu.memory_space<vmem>>, %arg7: memref<1x9x256xf32, #tpu.memory_space<vmem>>, %arg8: memref<1x36x256xf32, #tpu.memory_space<vmem>>) attributes {dimension_semantics = [#tpu.dimension_semantics<parallel>, #tpu.dimension_semantics<parallel>], iteration_bounds = array<i64: 1, 2>, scalar_prefetch = 0 : i64, scratch_operands = 0 : i64, tpu.core_type = #tpu.core_type<tc>, window_params = [{transform_indices = @transform_0, window_bounds = array<i64: 1, 32, 256>}, {pipeline_mode = #tpu.pipeline_mode<synchronous>, transform_indices = @transform_1, window_bounds = array<i64: 9, 32>}, {pipeline_mode = #tpu.pipeline_mode<synchronous>, transform_indices = @transform_2, window_bounds = array<i64: 9, 1>}, {pipeline_mode = #tpu.pipeline_mode<synchronous>, transform_indices = @transform_3, window_bounds = array<i64: 36, 32>}, {pipeline_mode = #tpu.pipeline_mode<synchronous>, transform_indices = @transform_4, window_bounds = array<i64: 36, 1>}, {transform_indices = @transform_5, window_bounds = array<i64: 1, 9, 256>}, {transform_indices = @transform_6, window_bounds = array<i64: 1, 36, 256>}]} {
    %c0 = arith.constant 0 : index
    %c0_0 = arith.constant 0 : index
    %c0_1 = arith.constant 0 : index
    %0 = vector.load %arg2[%c0, %c0_0, %c0_1] : memref<1x32x256xf32, #tpu.memory_space<vmem>>, vector<1x32x256xf32>
    %1 = vector.shape_cast %0 : vector<1x32x256xf32> to vector<32x256xf32>
    %2 = arith.truncf %1 : vector<32x256xf32> to vector<32x256xbf16>
    %c0_2 = arith.constant 0 : index
    %c0_3 = arith.constant 0 : index
    %3 = vector.load %arg3[%c0_2, %c0_3] : memref<9x32xbf16, #tpu.memory_space<vmem>>, vector<9x32xbf16>
    %cst = arith.constant dense<0.000000e+00> : vector<9x256xf32>
    %4 = tpu.matmul %3, %2, %cst {dimension_numbers = #tpu.dot_dimension_numbers<[1], [0], [0], [1], [0, 0, 1, 1], [], []>} : vector<9x32xbf16>, vector<32x256xbf16>, vector<9x256xf32> -> vector<9x256xf32>
    %c0_4 = arith.constant 0 : index
    %c0_5 = arith.constant 0 : index
    %5 = vector.load %arg4[%c0_4, %c0_5] : memref<9x1xf32, #tpu.memory_space<vmem>>, vector<9x1xf32>
    %6 = vector.broadcast %5 : vector<9x1xf32> to vector<9x256xf32>
    %7 = arith.addf %4, %6 : vector<9x256xf32>
    %c0_6 = arith.constant 0 : index
    %c0_7 = arith.constant 0 : index
    %8 = vector.load %arg5[%c0_6, %c0_7] : memref<36x32xbf16, #tpu.memory_space<vmem>>, vector<36x32xbf16>
    %cst_8 = arith.constant dense<0.000000e+00> : vector<36x256xf32>
    %9 = tpu.matmul %8, %2, %cst_8 {dimension_numbers = #tpu.dot_dimension_numbers<[1], [0], [0], [1], [0, 0, 1, 1], [], []>} : vector<36x32xbf16>, vector<32x256xbf16>, vector<36x256xf32> -> vector<36x256xf32>
    %c0_9 = arith.constant 0 : index
    %c0_10 = arith.constant 0 : index
    %10 = vector.load %arg6[%c0_9, %c0_10] : memref<36x1xf32, #tpu.memory_space<vmem>>, vector<36x1xf32>
    %11 = vector.broadcast %10 : vector<36x1xf32> to vector<36x256xf32>
    %12 = arith.addf %9, %11 : vector<36x256xf32>
    %c0_11 = arith.constant 0 : index
    %c0_12 = arith.constant 0 : index
    %c0_13 = arith.constant 0 : index
    %13 = vector.load %arg7[%c0_11, %c0_12, %c0_13] : memref<1x9x256xf32, #tpu.memory_space<vmem>>, vector<1x9x256xf32>
    %14 = vector.shape_cast %13 : vector<1x9x256xf32> to vector<9x256xf32>
    %15 = vector.shape_cast %7 : vector<9x256xf32> to vector<1x9x256xf32>
    tpu.vector_store %arg7[%c0_11, %c0_12, %c0_13], %15 {strides = array<i32>} : memref<1x9x256xf32, #tpu.memory_space<vmem>>, vector<1x9x256xf32>,
    %c0_14 = arith.constant 0 : index
    %c0_15 = arith.constant 0 : index
    %c0_16 = arith.constant 0 : index
    %16 = vector.load %arg8[%c0_14, %c0_15, %c0_16] : memref<1x36x256xf32, #tpu.memory_space<vmem>>, vector<1x36x256xf32>
    %17 = vector.shape_cast %16 : vector<1x36x256xf32> to vector<36x256xf32>
    %18 = vector.shape_cast %12 : vector<36x256xf32> to vector<1x36x256xf32>
    tpu.vector_store %arg8[%c0_14, %c0_15, %c0_16], %18 {strides = array<i32>} : memref<1x36x256xf32, #tpu.memory_space<vmem>>, vector<1x36x256xf32>,
    return
  }
  func.func @transform_0(%arg0: i32, %arg1: i32) -> (i32, i32, i32) {
    %c0_i32 = arith.constant 0 : i32
    %c0_i32_0 = arith.constant 0 : i32
    return %arg1, %c0_i32, %arg0 : i32, i32, i32
  }
  func.func @transform_1(%arg0: i32, %arg1: i32) -> (i32, i32) {
    %c0_i32 = arith.constant 0 : i32
    %c0_i32_0 = arith.constant 0 : i32
    %c0_i32_1 = arith.constant 0 : i32
    return %c0_i32, %c0_i32_0 : i32, i32
  }
  func.func @transform_2(%arg0: i32, %arg1: i32) -> (i32, i32) {
    %c0_i32 = arith.constant 0 : i32
    %c0_i32_0 = arith.constant 0 : i32
    %c0_i32_1 = arith.constant 0 : i32
    return %c0_i32, %c0_i32_0 : i32, i32
  }
  func.func @transform_3(%arg0: i32, %arg1: i32) -> (i32, i32) {
    %c0_i32 = arith.constant 0 : i32
    %c0_i32_0 = arith.constant 0 : i32
    %c0_i32_1 = arith.constant 0 : i32
    return %c0_i32, %c0_i32_0 : i32, i32
  }
  func.func @transform_4(%arg0: i32, %arg1: i32) -> (i32, i32) {
    %c0_i32 = arith.constant 0 : i32
    %c0_i32_0 = arith.constant 0 : i32
    %c0_i32_1 = arith.constant 0 : i32
    return %c0_i32, %c0_i32_0 : i32, i32
  }
  func.func @transform_5(%arg0: i32, %arg1: i32) -> (i32, i32, i32) {
    %c0_i32 = arith.constant 0 : i32
    %c0_i32_0 = arith.constant 0 : i32
    return %arg1, %c0_i32, %arg0 : i32, i32, i32
  }
  func.func @transform_6(%arg0: i32, %arg1: i32) -> (i32, i32, i32) {
    %c0_i32 = arith.constant 0 : i32
    %c0_i32_0 = arith.constant 0 : i32
    return %arg1, %c0_i32, %arg0 : i32, i32, i32
  }
}

</mosaic_0001>

<bundles_post_ra>
// kernel: tpu_custom_call.1
= control target key start
LH: loop header
LB: loop body
LE: loop exit
PB: predicated region body
PF: predicated region fallthrough
CT: control target
= control target key end

     0   :  { %12 = vsyncpa [#allocation3], 0  ;;  %s1070_s0 = inlined_call_operand.hbm [shape: f32[2,32,256], index: 0, kind: input, shape index: {}]   ;;  %s1071_s1 = inlined_call_operand.vmem [shape: bf16[9,32], index: 1, kind: input, shape index: {}]   ;;  %s1072_s2 = inlined_call_operand.vmem [shape: f32[9,1], index: 2, kind: input, shape index: {}]   ;;  %s1073_s3 = inlined_call_operand.vmem [shape: bf16[36,32], index: 3, kind: input, shape index: {}]   ;;  %s1074_s4 = inlined_call_operand.vmem [shape: f32[36,1], index: 4, kind: input, shape index: {}]   ;;  %s1075_s5 = inlined_call_operand.vmem [shape: f32[2,9,256], index: 5, kind: output, shape index: {0}]   ;;  %s1076_s6 = inlined_call_operand.vmem [shape: f32[2,36,256], index: 6, kind: output, shape index: {1}]  }
   0x1   :  { %14 = vsyncpa [#allocation3 + $0x1], 0  ;;  %s894_s21 = smov 0   ;;  %s896_s22 = smov 0  }
   0x2   :  { %s898_s23 = smov 0   ;;  %s900_s24 = smov 0  }
   0x3   :  { %s902_s25 = smov 0   ;;  %s904_s26 = smov 0  }
   0x4 LB: > { %s680_s27 = sadd.s32 4294967295, %s853_s26   ;;  %s29_s28 = sadd.s32 1, %s849_s25  ;;  %s853_s26 = sphi %s904_s26, %s20_s26   ;;  %s849_s25 = sphi %s902_s25, %s1084_s25   ;;  %s845_s24 = sphi %s900_s24, %s1083_s24   ;;  %s841_s23 = sphi %s898_s23, %s1082_s23   ;;  %s837_s22 = sphi %s896_s22, %s1081_s22   ;;  %s833_s21 = sphi %s894_s21, %s1080_s21  }
   0x5   : > { %p30_p0 = scmp.ge.s32.totalorder %s29_s28, 2  ;;  %s41_s29 = sadd.s32 1, %s841_s23 }
   0x6   : > { %p48_p1 = scmp.ne.s32.totalorder %s841_s23, %s837_s22  ;;  %p49_p2 = scmp.eq.s32.totalorder %s853_s26, 0 }
   0x7   : > { %s1086_s28 = smov (%p30_p0, %s29_s28), 0  ;;  %p54_p4 = scmp.ne.s32.totalorder %s837_s22, %s833_s21 }
   0x8   : > { %p930_p3 = por %p49_p2, %p48_p1  ;;  %s36_s7 = ssub.s32 %s849_s25, %s1086_s28 }
   0x9   : > { %p55_p5 = scmp.eq.s32.totalorder %s680_s27, 0  ;;  %p39_p6 = scmp.eq.s32.totalorder %s36_s7, 0 }
   0xa   : > { %p715_p8 = scmp.lt.s32.totalorder %s853_s26, 2  ;;  %s230_s10 = sand.u32 1, %s841_s23  }
   0xb   : > { %p937_p7 = por %p55_p5, %p54_p4  ;;  %s702_s11 = sshll.u32 %s849_s25, 10 }
   0xc   : > { %s943_s9 = scalar_select %p39_p6, %s841_s23, %s41_s29  }
   0xd   : > { %s684_s12 = sshll.u32 %s230_s10, 6  ;;  %s950_s15 = scalar_lea.hbm %s1070_s0, %s702_s11 }
   0xe   : > { %s234_s16 = scalar_lea.vmem [#allocation2], %s684_s12  ;;  %p954_p9 = pnand %p715_p8, %p930_p3 }
   0xf   : > { %s243_s17 = sshll.u32 %s234_s16, 4  ;;  %s960_s19 = scalar_lea.sflag [#allocation3], %s230_s10  ;;  %s958_s17 = int_to_ptr.vmem [resolvable:$true] %s243_s17 }
  0x10   : > { %s773_s20 = scalar_lea.hbm %s950_s15, 1024  ;;  %p775_p11 = pneg %p954_p9 }
  0x11   : > { %p774_p10 = scmp.ne.s32.totalorder %s950_s15, %s773_s20  ;;  %s778_s29 = scalar_lea.hbm %s1070_s0, 2048 }
  0x12   : > { %p779_p0 = scmp.lt.u32.totalorder %s950_s15, %s1070_s0  ;;  %p780_p1 = scmp.lt.u32.totalorder %s778_s29, %s773_s20 }
  0x13   : > { %p776_p12 = pnand %p775_p11, %p774_p10  ;;  %p782_p3 = scmp.lt.u32.totalorder %s773_s20, %s950_s15 }
  0x14   : > { %p781_p2 = por %p780_p1, %p779_p0 }
  0x15   : > { %p777_p13 = pneg %p776_p12 }
  0x16   : > { %p783_p4 = por %p782_p3, %p781_p2 }
  0x18   : > { %p784_p5 = pnand %p783_p4, %p777_p13 }
  0x1a   : > { %787 = shalt.err (!%p784_p5)
}
  0x1b   : > { %s788_s10 = scalar_lea.vmem %s958_s17, 1024  ;;  %s855_s11 = smov [#allocation2]  }
  0x1c   : > { %p789_p6 = scmp.ne.s32.totalorder %s958_s17, %s788_s10  ;;  %s793_s12 = sshll.u32 %s855_s11, 4  ;;  %s794_s12 = int_to_ptr.vmem [resolvable:$false] %s793_s12 }
  0x1d   : > { %s795_s13 = scalar_lea.vmem %s794_s12, 2048  ;;  %p796_p12 = scmp.lt.s32.totalorder %s958_s17, %s794_s12 }
  0x1e   : > { %p791_p8 = pnand %p789_p6, %p775_p11  ;;  %p797_p0 = scmp.lt.s32.totalorder %s795_s13, %s788_s10 }
  0x20   : > { %p792_p10 = pneg %p791_p8  ;;  %p798_p1 = por %p797_p0, %p796_p12 }
  0x22   : > { %p799_p2 = pnand %p798_p1, %p792_p10 }
  0x24   : > { %802 = shalt.err (!%p799_p2)
}
  0x25   : > { %s856_s14 = smov 256   ;;  %s857_s16 = smov 16  }
  0x26   : > { %714 = dma.hbm_to_vmem [thread:$0]  (!%p954_p9), %s950_s15, 1024, %s958_s17, %s960_s19, %s856_s14, %s856_s14, %s857_s16  }
  0x27   : > { %p687_p11 = scmp.ge.s32.totalorder %s853_s26, 1  ;;  %p251_p13 = scmp.lt.s32.totalorder %s853_s26, 3 }
  0x29   : > { %p252_p3 = pnand %p687_p11, %p251_p13 }
  0x2a   : > { %s257_s20 = sand.u32 (!%p252_p3), 1, %s837_s22  }
  0x2b   : > { %255 = sbr.rel (%p252_p3) target bundleno = 288 (0x120), region = 40  ;;  %s688_s21 = sshll.u32 (!%p252_p3), %s257_s20, 6 }
  0x2c   : > { %s258_s27 = scalar_lea.sflag (!%p252_p3), [#allocation3], %s257_s20  ;;  %s261_s29 = scalar_lea.vmem (!%p252_p3), [#allocation2], %s688_s21 }
  0x32   : > { %828 = dma.done.wait (%p937_p7), %s258_s27, 1024  }
  0x33   : > { %830 = vsyncadd (%p937_p7), %s258_s27, 4294966272  ;;  %v858_v0 = vmov 0   ;;  %v326_v1 = vld [vmem:[%s261_s29 + $0x8] sm:$0xff]  ;;  %v328_v2 = vld [vmem:[%s261_s29 + $0x18] sm:$0xff]  ;;  %vm356_vm0 = vcmask 261120   ;;  %p305_p7 = scmp.lt.s32.totalorder %s845_s24, 1 }
  0x34   : > { %392 = vmatprep.mubr.bf16.mxu0 %v858_v0  ;;  %502 = vmatprep.mubr.bf16.mxu1 %v858_v0  ;;  %v325_v3 = vld [vmem:[%s261_s29] sm:$0xff]  ;;  %v334_v4 = vpack.c.bf16 %v328_v2, %v326_v1  ;;  %v327_v5 = vld [vmem:[%s261_s29 + $0x10] sm:$0xff]  ;;  %v330_v6 = vld [vmem:[%s261_s29 + $0x28] sm:$0xff] }
  0x35   : > { %767 = vset.pattern.permute.xlu0 %v858_v0  ;;  %768 = vset.pattern.permute.xlu1 %v858_v0  ;;  %v332_v7 = vld [vmem:[%s261_s29 + $0x38] sm:$0xff]  ;;  %v333_v8 = vpack.c.bf16 %v327_v5, %v325_v3  ;;  %v329_v10 = vld [vmem:[%s261_s29 + $0x20] sm:$0xff]  ;;  %v331_v11 = vld [vmem:[%s261_s29 + $0x30] sm:$0xff]  ;;  %s1088_s24 = smov (!%p305_p7, %s845_s24), 1 }
  0x36   : > { %v336_v9 = vpack.c.bf16 %v332_v7, %v330_v6  ;;  %360 = vmatprep.subr.bf16.mxu0 %v334_v4  ;;  %704 = vmatprep.subr.bf16.mxu1 %v334_v4  ;;  %v335_v12 = vpack.c.bf16 %v331_v11, %v329_v10  ;;  %v339_v13 = vld [vmem:[%s1072_s2] sm:$0xff]  ;;  %v770_v15 = vld [vmem:[%s1073_s3 + $0x8] sm:$0xff]   ;;  %v772_v20 = vld [vmem:[%s1073_s3 + $0x10] ss:$0 sps:$4 sm:$0x33]   ;;  %s708_s30 = smul.u32 80, %s1088_s24 }
  0x37   : > { %361 = vmatpush1.bf16.msra.mxu0 %v333_v8  ;;  %706 = vmatpush1.bf16.msra.mxu1 %v333_v8  ;;  %v769_v14 = vld [vmem:[%s1071_s1] sm:$0x1f]   ;;  %v340_v17 = vld [vmem:[%s1072_s2 + $0x8] sm:$0x1]  ;;  %v410_v21 = vld [vmem:[%s1074_s4 + $0x10] sm:$0xff]  ;;  %s703_s7 = sshll.u32 %s1088_s24, 5 }
  0x38   : > { %362 = vmatprep.subr.bf16.mxu0 %v336_v9  ;;  %705 = vmatprep.subr.bf16.mxu1 %v336_v9  ;;  %v408_v16 = vld [vmem:[%s1074_s4] sm:$0xff]  ;;  %v409_v18 = vld [vmem:[%s1074_s4 + $0x8] sm:$0xff]  ;;  %v411_v22 = vld [vmem:[%s1074_s4 + $0x18] sm:$0xff]  ;;  %s312_s12 = scalar_lea.vmem %s1075_s5, %s703_s7  ;;  %s1040_s16 = scalar_lea.vmem %s1076_s6, %s708_s30 }
  0x39   : > { %343 = vperm.xlu0 %767, %v339_v13   ;;  %415 = vperm.xlu1 %768, %v408_v16   ;;  %v771_v19 = vld [vmem:[%s1073_s3] sm:$0xff]  }
  0x3a   : > { %v412_v23 = vld [vmem:[%s1074_s4 + $0x20] sm:$0xf] }
  0x3b   : > { %363 = vmatpush1.bf16.msra.mxu0 %v335_v12  ;;  %707 = vmatpush1.bf16.msra.mxu1 %v335_v12 }
  0x3c   : > { %460 = vmatprep.subr.bf16.mxu0 %v334_v4 }
  0x3d   : > { %348 = vperm.xlu0 %767, %v340_v17   ;;  %420 = vperm.xlu1 %768, %v409_v18  }
  0x3e   : > { %693 = vmatmul.mubr.msk.bf16.vlgmr.msra.gmra.mrb[0].mxu0 %vm356_vm0, %v769_v14  ;;  %698 = vmatmul.mubr.msk.bf16.vlgmr.msra.gmra.mrb[0].mxu1 %vm356_vm0, %v770_v15 }
  0x3f   : > { %461 = vmatpush1.bf16.msra.mxu0 %v333_v8  ;;  %492 = vmatprep.mubr.bf16.mxu0 %v858_v0 }
  0x40   : > { %462 = vmatprep.subr.bf16.mxu0 %v336_v9  ;;  %512 = vmatprep.mubr.bf16.mxu1 %v858_v0 }
  0x41   : > { %425 = vperm.xlu0 %767, %v410_v21   ;;  %430 = vperm.xlu1 %768, %v411_v22  }
  0x43   : > { %463 = vmatpush1.bf16.msra.mxu0 %v335_v12 }
  0x45   : > { %435 = vperm.xlu0 %767, %v412_v23  }
  0x46   : > { %697 = vmatmul.mubr.msk.bf16.vlgmr.msra.gmra.mrb[4].mxu0 %vm356_vm0, %v771_v19  ;;  %699 = vmatmul.mubr.msk.bf16.gmra.mrb[4].mxu1 %vm356_vm0, %v772_v20 }
  0xb8   : > { %v344_v24 = vpop.permute.xlu0 %343  ;;  %v416_v25 = vpop.permute.xlu1 %415 }
  0xbc   : > { %v349_v26 = vpop.permute.xlu0 %348  ;;  %v421_v27 = vpop.permute.xlu1 %420 }
  0xc0   : > { %v426_v28 = vpop.permute.xlu0 %425  ;;  %v431_v29 = vpop.permute.xlu1 %430 }
  0xc4   : > { %v436_v46 = vpop.permute.xlu0 %435 }
 0x111   : > { %v394_v30 = vpop.f32.mrb[0].mxu0  ;;  %v504_v31 = vpop.f32.mrb[0].mxu1 }
 0x112   : > { %v395_v32 = vadd.f32 %v394_v30, %v344_v24  ;;  %v505_v33 = vadd.f32 %v504_v31, %v426_v28  ;;  %v396_v34 = vpop.f32.mrb[1].mxu0  ;;  %v506_v35 = vpop.f32.mrb[1].mxu1 }
 0x113   : > { %v397_v36 = vadd.f32 %v396_v34, %v344_v24  ;;  %v507_v37 = vadd.f32 %v506_v35, %v426_v28  ;;  %v398_v38 = vpop.f32.mrb[2].mxu0  ;;  %v508_v39 = vpop.f32.mrb[2].mxu1 }
 0x114   : > { %521 = vst [vmem:[%s312_s12] sm:$0xff] %v395_v32  ;;  %529 = vst [vmem:[%s1040_s16 + $0x20] sm:$0xff] %v505_v33  ;;  %v399_v40 = vadd.f32 %v398_v38, %v349_v26  ;;  %v509_v41 = vadd.f32 %v508_v39, %v431_v29  ;;  %v400_v42 = vpop.f32.mrb[3].mxu0  ;;  %v510_v43 = vpop.f32.mrb[3].mxu1 }
 0x115   : > { %522 = vst [vmem:[%s312_s12 + $0x8] sm:$0xff] %v397_v36  ;;  %530 = vst [vmem:[%s1040_s16 + $0x28] sm:$0xff] %v507_v37  ;;  %v401_v44 = vadd.f32 %v400_v42, %v349_v26  ;;  %v511_v45 = vadd.f32 %v510_v43, %v431_v29 }
 0x116   : > { %523 = vst [vmem:[%s312_s12 + $0x10] sm:$0x1] %v399_v40  ;;  %531 = vst [vmem:[%s1040_s16 + $0x30] sm:$0xff] %v509_v41 }
 0x117   : > { %524 = vst [vmem:[%s312_s12 + $0x18] sm:$0x1] %v401_v44  ;;  %532 = vst [vmem:[%s1040_s16 + $0x38] sm:$0xff] %v511_v45 }
 0x119   : > { %v494_v47 = vpop.f32.mrb[4].mxu0  ;;  %v514_v48 = vpop.f32.mrb[4].mxu1 }
 0x11a   : > { %v495_v49 = vadd.f32 %v494_v47, %v416_v25  ;;  %v515_v50 = vadd.f32 %v514_v48, %v436_v46  ;;  %v496_v51 = vpop.f32.mrb[5].mxu0  ;;  %v516_v52 = vpop.f32.mrb[5].mxu1 }
 0x11b   : > { %v497_v53 = vadd.f32 %v496_v51, %v416_v25  ;;  %v517_v54 = vadd.f32 %v516_v52, %v436_v46  ;;  %v498_v55 = vpop.f32.mrb[6].mxu0  ;;  %v518_v56 = vpop.f32.mrb[6].mxu1 }
 0x11c   : > { %525 = vst [vmem:[%s1040_s16] sm:$0xff] %v495_v49  ;;  %533 = vst [vmem:[%s1040_s16 + $0x40] sm:$0xf] %v515_v50  ;;  %v499_v57 = vadd.f32 %v498_v55, %v421_v27  ;;  %v500_v58 = vpop.f32.mrb[7].mxu0  ;;  %v519_v59 = vpop.f32.mrb[7].mxu1 }
 0x11d   : > { %526 = vst [vmem:[%s1040_s16 + $0x8] sm:$0xff] %v497_v53  ;;  %534 = vst [vmem:[%s1040_s16 + $0x48] sm:$0xf] %v517_v54  ;;  %v501_v60 = vadd.f32 %v500_v58, %v421_v27 }
 0x11e   : > { %527 = vst [vmem:[%s1040_s16 + $0x10] sm:$0xff] %v499_v57 }
 0x11f   : > { %528 = vst [vmem:[%s1040_s16 + $0x18] sm:$0xff] %v501_v60 }
 0x120 PF: > { %s20_s26 = sadd.s32 1, %s853_s26   ;;  %s1080_s21 = smov %s837_s22 }
 0x121   : > { %p17_p9 = scmp.ge.s32.totalorder %s20_s26, 4   ;;  %s1081_s22 = smov %s841_s23 }
 0x122   : > { %s1082_s23 = smov %s943_s9  ;;  %s1083_s24 = smov %s849_s25 }
 0x123   : > { %s1084_s25 = smov %s1086_s28  ;;  %19 = sbr.rel (!%p17_p9) target bundleno = 4 (0x4), region = 92 }
 0x12a   :  { %590 = vsyncpa [#allocation3], 1 }
 0x12b   :  { %592 = vsyncpa [#allocation3 + $0x1], 1 }

</bundles_post_ra>
